<compile_context>
chip_gen: v7x
topology: tpu7x:2x2x1
jax: 0.10.0
libtpu: 0.0.40
codegen_flags: <defaults>
</compile_context>

<pallas_src>
import jax
import jax.numpy as jnp
from jax.experimental import pallas as pl
from jax.experimental.pallas import tpu as pltpu

_LANES = 128                            # vreg lane width
_TARGET_BLOCK_BYTES = 2 * 1024 * 1024   # ~2 MiB per operand block


def _residual_add_kernel(fn_out_ref, x_ref, o_ref):
    # elementwise hot path: out = fn(x) + x
    o_ref[...] = fn_out_ref[...] + x_ref[...]


def _sublanes_for(dtype):
    """Native sublane depth for the dtype (sub-32-bit types pack along sublanes)."""
    itemsize = jnp.dtype(dtype).itemsize
    return 8 * max(1, 4 // itemsize)  # f32 -> 8, bf16/f16 -> 16, int8/fp8 -> 32


def _round_down(v, m):
    return (v // m) * m


def _pallas_residual_add(fn_out, x):
    """out = fn_out + x, computed with a tiled Pallas TPU kernel."""
    assert fn_out.shape == x.shape, (fn_out.shape, x.shape)
    assert fn_out.dtype == x.dtype, (fn_out.dtype, x.dtype)
    orig_shape = x.shape
    n = x.size
    dtype = x.dtype
    itemsize = jnp.dtype(dtype).itemsize

    if n == 0:
        return fn_out + x

    if n % _LANES != 0:
        # TODO(synk): totals that are not a multiple of 128 lanes fall back to
        # the XLA elementwise add (same 3n bytes of HBM traffic, no extra
        # pad/slice passes); a scalar-prefetched masked tail block would keep
        # these rare ragged shapes on the Pallas path.
        return fn_out + x

    # Widest lane-dense last dim that divides n -> wider unmasked vld/vst runs.
    lane_width = _LANES
    for cand in (1024, 512, 256):
        if n % cand == 0:
            lane_width = cand
            break
    rows = n // lane_width
    sublanes = _sublanes_for(dtype)

    # Flat reshapes of contiguous buffers are free (no HBM round trip).
    f2 = fn_out.reshape(rows, lane_width)
    x2 = x.reshape(rows, lane_width)

    if rows <= sublanes:
        # Tiny array: single full-extent block (block dims == array dims).
        block_rows = rows
    else:
        # ~2 MiB lane-dense blocks, a multiple of the sublane depth.
        target_rows = max(
            sublanes,
            _round_down(_TARGET_BLOCK_BYTES // (lane_width * itemsize), sublanes))
        # Cap so the grid has at least 2 steps: with
        # dimension_semantics=("parallel",) both v7x TensorCores participate
        # on mid-size activations instead of collapsing to grid=(1,).
        half_rows = max(sublanes, _round_down(pl.cdiv(rows, 2), sublanes))
        block_rows = min(target_rows, half_rows)

    grid = (pl.cdiv(rows, block_rows),)

    # NOTE: input 0 and the output MUST keep an identical BlockSpec (shape and
    # index_map).  input_output_aliases={0: 0} reuses fn_out's HBM buffer for
    # the output, which is only safe because every grid step overwrites
    # exactly the region it already read.  Partial last blocks are masked by
    # Pallas (only the in-bounds region is written back).
    block_spec = pl.BlockSpec((block_rows, lane_width), lambda i: (i, 0))

    out2 = pl.pallas_call(
        _residual_add_kernel,
        out_shape=jax.ShapeDtypeStruct((rows, lane_width), dtype),
        grid_spec=pltpu.PrefetchScalarGridSpec(
            num_scalar_prefetch=0,
            grid=grid,
            in_specs=[block_spec, block_spec],
            out_specs=block_spec,
        ),
        compiler_params=pltpu.CompilerParams(
            dimension_semantics=("parallel",),
            # 3 operands x 2 buffers x <=2 MiB = <=12 MiB double-buffered
            # footprint; 32 MiB stays inside v7x's scoped limit and above
            # v5e's 16 MiB default so the DMA pipeline is never squeezed.
            vmem_limit_bytes=32 * 1024 * 1024,
        ),
        input_output_aliases={0: 0},   # reuse fn_out's HBM buffer for the output
        cost_estimate=pl.CostEstimate(
            flops=n, transcendentals=0, bytes_accessed=3 * n * itemsize),
    )(f2, x2)

    return out2.reshape(orig_shape)


class Residual:
    """JAX/Pallas port of the PyTorch Residual wrapper."""

    def __init__(self, fn):
        self.fn = fn

    def __call__(self, x, *args, **kwargs):
        # TODO(synk): the biggest remaining lever is fusing the +x into fn's
        # producing kernel / XLA epilogue (removes the fn_out write+read);
        # that is per-fn, so here fn runs as plain JAX and only the residual
        # add is the Pallas kernel.
        fn_out = self.fn(x, *args, **kwargs)
        return _pallas_residual_add(fn_out, x)


def make_pointwise_conv(channels, key):
    """A representative deterministic `fn`: a 1x1 conv over NCHW input."""
    kw, kb = jax.random.split(key)
    w = jax.random.normal(kw, (channels, channels), jnp.float32) * 0.1
    b = jax.random.normal(kb, (channels,), jnp.float32) * 0.1

    def fn(x):
        # x: (N, C, H, W)  -> 1x1 conv == channel-mixing matmul
        y = jnp.einsum('oc,nchw->nohw', w, x)
        return y + b[None, :, None, None]

    return fn


if __name__ == "__main__":
    key = jax.random.PRNGKey(0)
    k_x, k_fn = jax.random.split(key)

    # --- test 1: f32, NCHW UNet-block shape, 1x1-conv fn (jitted path) ------
    x = jax.random.normal(k_x, (2, 4, 16, 16), jnp.float32)
    fn = make_pointwise_conv(4, k_fn)
    residual = Residual(fn)

    out = jax.jit(lambda t: residual(t))(x)
    out = jax.block_until_ready(out)
    ref = fn(x) + x
    assert out.shape == x.shape and out.dtype == x.dtype
    assert jnp.allclose(out, ref, atol=1e-5, rtol=1e-5), "f32 mismatch vs reference"

    # --- test 2: bf16 input exercises dtype-aware sublane packing -----------
    x_bf16 = x.astype(jnp.bfloat16)
    res_tanh = Residual(jnp.tanh)
    out_bf16 = jax.block_until_ready(res_tanh(x_bf16))
    ref_bf16 = jnp.tanh(x_bf16) + x_bf16
    assert out_bf16.shape == x_bf16.shape and out_bf16.dtype == jnp.bfloat16
    assert jnp.allclose(out_bf16.astype(jnp.float32),
                        ref_bf16.astype(jnp.float32), atol=1e-2, rtol=1e-2), \
        "bf16 mismatch vs reference"

    # --- test 3: lane-aligned but sublane-ragged size -> multi-step grid ----
    # 2*4*144 = 1152 = 9 * 128 elements: rows=9 f32 -> block_rows=8,
    # grid=(2,), masked partial last block, aliased output writeback.
    x_part = jax.random.normal(k_x, (2, 4, 144), jnp.float32)
    out_part = jax.block_until_ready(Residual(jnp.tanh)(x_part))
    ref_part = jnp.tanh(x_part) + x_part
    assert out_part.shape == x_part.shape
    assert jnp.allclose(out_part, ref_part, atol=1e-5, rtol=1e-5), \
        "partial-block mismatch vs reference"

    # --- test 4: truly ragged size exercises the XLA fallback path ----------
    x_rag = jax.random.normal(k_x, (3, 5, 7), jnp.float32)
    out_rag = jax.block_until_ready(Residual(jnp.tanh)(x_rag))
    ref_rag = jnp.tanh(x_rag) + x_rag
    assert out_rag.shape == x_rag.shape
    assert jnp.allclose(out_rag, ref_rag, atol=1e-5, rtol=1e-5), \
        "ragged mismatch vs reference"

    print("KERNEL_OK")
</pallas_src>

<mosaic_0001>
module attributes {stable_mosaic.version = 11 : i64} {
  func.func @_residual_add_kernel(%arg0: i32, %arg1: memref<2x1024xf32, #tpu.memory_space<vmem>>, %arg2: memref<2x1024xf32, #tpu.memory_space<vmem>>, %arg3: memref<2x1024xf32, #tpu.memory_space<vmem>>) attributes {dimension_semantics = [#tpu.dimension_semantics<parallel>], iteration_bounds = array<i64: 1>, scalar_prefetch = 0 : i64, scratch_operands = 0 : i64, tpu.core_type = #tpu.core_type<tc>, window_params = [{transform_indices = @transform_0, window_bounds = array<i64: 2, 1024>}, {transform_indices = @transform_1, window_bounds = array<i64: 2, 1024>}, {transform_indices = @transform_2, window_bounds = array<i64: 2, 1024>}]} {
    %c0 = arith.constant 0 : index
    %c0_0 = arith.constant 0 : index
    %0 = vector.load %arg1[%c0, %c0_0] : memref<2x1024xf32, #tpu.memory_space<vmem>>, vector<2x1024xf32>
    %c0_1 = arith.constant 0 : index
    %c0_2 = arith.constant 0 : index
    %1 = vector.load %arg2[%c0_1, %c0_2] : memref<2x1024xf32, #tpu.memory_space<vmem>>, vector<2x1024xf32>
    %2 = arith.addf %0, %1 : vector<2x1024xf32>
    %c0_3 = arith.constant 0 : index
    %c0_4 = arith.constant 0 : index
    %3 = vector.load %arg3[%c0_3, %c0_4] : memref<2x1024xf32, #tpu.memory_space<vmem>>, vector<2x1024xf32>
    tpu.vector_store %arg3[%c0_3, %c0_4], %2 {strides = array<i32>} : memref<2x1024xf32, #tpu.memory_space<vmem>>, vector<2x1024xf32>,
    return
  }
  func.func @transform_0(%arg0: i32) -> (i32, i32) {
    %c0_i32 = arith.constant 0 : i32
    %c0_i32_0 = arith.constant 0 : i32
    return %arg0, %c0_i32 : i32, i32
  }
  func.func @transform_1(%arg0: i32) -> (i32, i32) {
    %c0_i32 = arith.constant 0 : i32
    %c0_i32_0 = arith.constant 0 : i32
    return %arg0, %c0_i32 : i32, i32
  }
  func.func @transform_2(%arg0: i32) -> (i32, i32) {
    %c0_i32 = arith.constant 0 : i32
    %c0_i32_0 = arith.constant 0 : i32
    return %arg0, %c0_i32 : i32, i32
  }
}

</mosaic_0001>

<bundles_post_ra>
// kernel: _lambda_.1
= control target key start
LH: loop header
LB: loop body
LE: loop exit
PB: predicated region body
PF: predicated region fallthrough
CT: control target
= control target key end

     0   :  { %s56_s0 = inlined_call_operand.vmem [shape: f32[2,1024], index: 0, kind: input, shape index: {}, may-alias: {0,2}]   ;;  %s57_s1 = inlined_call_operand.vmem [shape: f32[2,1024], index: 1, kind: input, shape index: {}]   ;;  %s58_s2 = inlined_call_operand.vmem [shape: f32[2,1024], index: 2, kind: output, shape index: {}, may-alias: {0,2}]  }
   0x1   :  { %v11_v0 = vld [vmem:[%s56_s0] sm:$0xff]  ;;  %v12_v2 = vld [vmem:[%s56_s0 + $0x8] sm:$0xff] }
   0x2   :  { %v13_v1 = vld [vmem:[%s57_s1] sm:$0xff]  ;;  %v14_v4 = vld [vmem:[%s57_s1 + $0x8] sm:$0xff] }
   0x3   :  { %v15_v3 = vadd.f32 %v13_v1, %v11_v0  ;;  %v16_v5 = vadd.f32 %v14_v4, %v12_v2 }
   0x5   :  { %17 = vst [vmem:[%s58_s2] sm:$0xff] %v15_v3  ;;  %18 = vst [vmem:[%s58_s2 + $0x8] sm:$0xff] %v16_v5 }

</bundles_post_ra>
